<compile_context>
chip_gen: v7x
topology: tpu7x:2x2x1
jax: 0.10.0
libtpu: 0.0.40
codegen_flags: <defaults>
</compile_context>

<pallas_src>
import jax
import jax.numpy as jnp
from jax.experimental import pallas as pl
from jax.experimental.pallas import tpu as pltpu

IN_FEATURES = 300
HIDDEN = 50
OUT_FEATURES = 10


def _fused_mlp_logsoftmax_kernel(x1_ref, x2_ref, wa_ref, ba_ref, wb_ref, bb_ref, out_ref):
    """One batch tile of both branches.

    x1_ref/x2_ref: (TB, 300) bf16 input tiles.
    wa: (300, 100) f32 = [w1a | w2a]           ba: (1, 100) f32 = [b1a | b2a]
    wb: (100, 20)  f32 = blockdiag(w1b, w2b)   bb: (1, 20)  f32 = [b1b | b2b]
    out_ref block: (2, TB, 10) f32 -- out_ref[0] = branch-1 rows, out_ref[1] = branch-2 rows.
    """
    # Resident f32 weights; cast layer-1 weights to bf16 once per step (VPU slack) so
    # the dominant matmul uses the native bf16 MXU path with f32 accumulation.
    wa = wa_ref[...].astype(jnp.bfloat16)
    ba = ba_ref[...]

    # Layer 1: one MXU push per input (N=100 costs the same as N=50; those lanes were idle).
    g1 = jnp.maximum(
        jnp.dot(x1_ref[...], wa, preferred_element_type=jnp.float32) + ba, 0.0)
    g2 = jnp.maximum(
        jnp.dot(x2_ref[...], wa, preferred_element_type=jnp.float32) + ba, 0.0)

    # Lane-select so ONE block-diagonal matmul computes layer 2 of both branches:
    # keep branch-1 hidden units in lanes [0,50) and branch-2 hidden units in [50,100).
    lane = jax.lax.broadcasted_iota(jnp.int32, g1.shape, 1)
    g = jnp.where(lane < HIDDEN, g1, g2)

    z = jnp.dot(g, wb_ref[...], preferred_element_type=jnp.float32) + bb_ref[...]  # (TB, 20) f32

    def log_softmax(y):
        m = jnp.max(y, axis=1, keepdims=True)
        s = y - m
        return s - jnp.log(jnp.sum(jnp.exp(s), axis=1, keepdims=True))

    # Per-branch log_softmax stored directly into the two output halves
    # (no in-kernel concatenate / sublane re-layout of a (2B, 10) block).
    out_ref[0] = log_softmax(z[:, :OUT_FEATURES]).astype(out_ref.dtype)
    out_ref[1] = log_softmax(z[:, OUT_FEATURES:2 * OUT_FEATURES]).astype(out_ref.dtype)


def _choose_batch_tile(B, batch_tile):
    """Pick a batch tile that is legal ((8,128) constraint on partial blocks) and,
    for large batches, gives an even number of >= 2 grid steps (v7x dual-TC)."""
    MAX_TB = 2048  # ~1.2 MiB/input tile in bf16; ~10 MiB total double-buffered
    if batch_tile is not None:
        tb = min(int(batch_tile), B)
    elif B <= MAX_TB:
        tb = B
    else:
        pairs = pl.cdiv(B, 2 * MAX_TB)       # number of step-pairs
        tb = pl.cdiv(B, 2 * pairs)           # -> even step count, each <= ~MAX_TB
    if tb < B:
        tb = ((tb + 7) // 8) * 8             # sublane multiple for partial blocks
    return min(tb, B)


def multiple_input_net(x1, x2, packed, *, batch_tile=None):
    """Forward pass of MultipleInputNet as one Pallas call.

    x1, x2: (B, 300) float arrays (cast to bf16 for the HBM->VMEM stream).
    packed: dict with wa (300,100), ba (1,100), wb (100,20) blockdiag, bb (1,20)
            (see pack_params), all float32.
    Returns (2B, 10) float32 log-probabilities, identical to
    torch.cat((branch1(x1), branch2(x2)), 0) followed by log_softmax(dim=1).
    """
    B, F = x1.shape
    TB = _choose_batch_tile(B, batch_tile)
    grid = (pl.cdiv(B, TB),)

    # Halve the dominant HBM read traffic (kernel is memory bound on every generation).
    x1b = x1.astype(jnp.bfloat16)
    x2b = x2.astype(jnp.bfloat16)

    weight_bytes = (IN_FEATURES * 2 * HIDDEN + 2 * HIDDEN
                    + 2 * HIDDEN * 2 * OUT_FEATURES + 2 * OUT_FEATURES) * 4
    cost = pl.CostEstimate(
        flops=B * (2 * 2 * IN_FEATURES * 2 * HIDDEN            # two layer-1 matmuls
                   + 2 * (2 * HIDDEN) * (2 * OUT_FEATURES)),   # fused layer-2 matmul
        transcendentals=2 * B * (OUT_FEATURES + 1),            # exp + log per output row
        bytes_accessed=2 * B * IN_FEATURES * 2                  # bf16 inputs
                       + 2 * B * OUT_FEATURES * 4               # f32 output
                       + weight_bytes,
    )

    out = pl.pallas_call(
        _fused_mlp_logsoftmax_kernel,
        out_shape=jax.ShapeDtypeStruct((2, B, OUT_FEATURES), jnp.float32),
        grid_spec=pltpu.PrefetchScalarGridSpec(
            num_scalar_prefetch=0,
            grid=grid,
            in_specs=[
                pl.BlockSpec((TB, F), lambda i: (i, 0)),                          # x1 tile (bf16)
                pl.BlockSpec((TB, F), lambda i: (i, 0)),                          # x2 tile (bf16)
                pl.BlockSpec((F, 2 * HIDDEN), lambda i: (0, 0)),                  # packed W_a (resident)
                pl.BlockSpec((1, 2 * HIDDEN), lambda i: (0, 0)),                  # packed b_a
                pl.BlockSpec((2 * HIDDEN, 2 * OUT_FEATURES), lambda i: (0, 0)),   # blockdiag W_b
                pl.BlockSpec((1, 2 * OUT_FEATURES), lambda i: (0, 0)),            # packed b_b
            ],
            out_specs=pl.BlockSpec((2, TB, OUT_FEATURES), lambda i: (0, i, 0)),
        ),
        compiler_params=pltpu.CompilerParams(
            dimension_semantics=("parallel",),          # batch steps shard across TCs (v7x)
            vmem_limit_bytes=48 * 1024 * 1024,          # headroom for big tiles, < v7x 64 MiB
        ),
        cost_estimate=cost,
    )(x1b, x2b, packed["wa"], packed["ba"], packed["wb"], packed["bb"])

    # (2, B, 10) is row-major contiguous == torch.cat((y1, y2), 0): reshape is free.
    return out.reshape(2 * B, OUT_FEATURES)


def init_params(key):
    """Deterministic init mimicking nn.Linear's default U(-1/sqrt(fan_in), 1/sqrt(fan_in)).
    Weights stored as (in_features, out_features); biases as (1, out_features)."""
    def linear(key, fan_in, fan_out):
        kw, kb = jax.random.split(key)
        bound = 1.0 / jnp.sqrt(float(fan_in))
        w = jax.random.uniform(kw, (fan_in, fan_out), jnp.float32, -bound, bound)
        b = jax.random.uniform(kb, (1, fan_out), jnp.float32, -bound, bound)
        return w, b

    k1, k2, k3, k4 = jax.random.split(key, 4)
    w1a, b1a = linear(k1, IN_FEATURES, HIDDEN)
    w1b, b1b = linear(k2, HIDDEN, OUT_FEATURES)
    w2a, b2a = linear(k3, IN_FEATURES, HIDDEN)
    w2b, b2b = linear(k4, HIDDEN, OUT_FEATURES)
    return dict(w1a=w1a, b1a=b1a, w1b=w1b, b1b=b1b,
                w2a=w2a, b2a=b2a, w2b=w2b, b2b=b2b)


def pack_params(p):
    """One-time packing of the 8 per-branch tensors into 4 kernel arrays (kept f32)."""
    wa = jnp.concatenate([p["w1a"], p["w2a"]], axis=1)                      # (300, 100)
    ba = jnp.concatenate([p["b1a"], p["b2a"]], axis=1)                      # (1, 100)
    wb = jnp.zeros((2 * HIDDEN, 2 * OUT_FEATURES), jnp.float32)
    wb = wb.at[:HIDDEN, :OUT_FEATURES].set(p["w1b"])
    wb = wb.at[HIDDEN:, OUT_FEATURES:].set(p["w2b"])                        # blockdiag (100, 20)
    bb = jnp.concatenate([p["b1b"], p["b2b"]], axis=1)                      # (1, 20)
    return dict(wa=wa, ba=ba, wb=wb, bb=bb)


def _reference(x1, x2, p, *, quantize=True):
    """Pure-JAX reference. With quantize=True it mirrors the kernel's mixed-precision
    path (bf16 inputs + bf16 layer-1 weights, f32 accumulation / layer-2)."""
    q = (lambda a: a.astype(jnp.bfloat16).astype(jnp.float32)) if quantize else (lambda a: a)
    h1 = jax.nn.relu(q(x1) @ q(p["w1a"]) + p["b1a"])
    y1 = h1 @ p["w1b"] + p["b1b"]
    h2 = jax.nn.relu(q(x2) @ q(p["w2a"]) + p["b2a"])
    y2 = h2 @ p["w2b"] + p["b2b"]
    return jax.nn.log_softmax(jnp.concatenate([y1, y2], axis=0), axis=1)


if __name__ == "__main__":
    key = jax.random.PRNGKey(0)
    kp, kx1, kx2 = jax.random.split(key, 3)

    B = 8  # small batch
    raw_params = init_params(kp)
    packed = pack_params(raw_params)
    x1 = jax.random.normal(kx1, (B, IN_FEATURES), jnp.float32)
    x2 = jax.random.normal(kx2, (B, IN_FEATURES), jnp.float32)

    out = multiple_input_net(x1, x2, packed)
    out = jax.block_until_ready(out)

    assert out.shape == (2 * B, OUT_FEATURES)
    assert out.dtype == jnp.float32

    # Tight check vs a reference on the same mixed-precision path.
    ref_mp = _reference(x1, x2, raw_params, quantize=True)
    assert jnp.allclose(out, ref_mp, atol=1e-3, rtol=1e-3), "mismatch vs mixed-precision reference"

    # Loose check vs the full-f32 PyTorch-equivalent forward (bf16 input quantization only).
    ref_f32 = _reference(x1, x2, raw_params, quantize=False)
    assert jnp.allclose(out, ref_f32, atol=5e-2, rtol=0.0), "drifted from f32 reference"

    print("KERNEL_OK")
</pallas_src>

<mosaic_0001>
module attributes {stable_mosaic.version = 11 : i64} {
  func.func @_fused_mlp_logsoftmax_kernel(%arg0: i32, %arg1: memref<8x300xbf16, #tpu.memory_space<vmem>>, %arg2: memref<8x300xbf16, #tpu.memory_space<vmem>>, %arg3: memref<300x100xf32, #tpu.memory_space<vmem>>, %arg4: memref<1x100xf32, #tpu.memory_space<vmem>>, %arg5: memref<100x20xf32, #tpu.memory_space<vmem>>, %arg6: memref<1x20xf32, #tpu.memory_space<vmem>>, %arg7: memref<2x8x10xf32, #tpu.memory_space<vmem>>) attributes {dimension_semantics = [#tpu.dimension_semantics<parallel>], iteration_bounds = array<i64: 1>, scalar_prefetch = 0 : i64, scratch_operands = 0 : i64, tpu.core_type = #tpu.core_type<tc>, window_params = [{transform_indices = @transform_0, window_bounds = array<i64: 8, 300>}, {transform_indices = @transform_1, window_bounds = array<i64: 8, 300>}, {pipeline_mode = #tpu.pipeline_mode<synchronous>, transform_indices = @transform_2, window_bounds = array<i64: 300, 100>}, {pipeline_mode = #tpu.pipeline_mode<synchronous>, transform_indices = @transform_3, window_bounds = array<i64: 1, 100>}, {pipeline_mode = #tpu.pipeline_mode<synchronous>, transform_indices = @transform_4, window_bounds = array<i64: 100, 20>}, {pipeline_mode = #tpu.pipeline_mode<synchronous>, transform_indices = @transform_5, window_bounds = array<i64: 1, 20>}, {transform_indices = @transform_6, window_bounds = array<i64: 2, 8, 10>}]} {
    %c0 = arith.constant 0 : index
    %c0_0 = arith.constant 0 : index
    %0 = vector.load %arg3[%c0, %c0_0] : memref<300x100xf32, #tpu.memory_space<vmem>>, vector<300x100xf32>
    %1 = arith.truncf %0 : vector<300x100xf32> to vector<300x100xbf16>
    %c0_1 = arith.constant 0 : index
    %c0_2 = arith.constant 0 : index
    %2 = vector.load %arg4[%c0_1, %c0_2] : memref<1x100xf32, #tpu.memory_space<vmem>>, vector<1x100xf32>
    %c0_3 = arith.constant 0 : index
    %c0_4 = arith.constant 0 : index
    %3 = vector.load %arg1[%c0_3, %c0_4] : memref<8x300xbf16, #tpu.memory_space<vmem>>, vector<8x300xbf16>
    %cst = arith.constant dense<0.000000e+00> : vector<8x100xf32>
    %4 = tpu.matmul %3, %1, %cst {dimension_numbers = #tpu.dot_dimension_numbers<[1], [0], [0], [1], [0, 0, 1, 1], [], []>} : vector<8x300xbf16>, vector<300x100xbf16>, vector<8x100xf32> -> vector<8x100xf32>
    %5 = vector.broadcast %2 : vector<1x100xf32> to vector<8x100xf32>
    %6 = arith.addf %4, %5 : vector<8x100xf32>
    %cst_5 = arith.constant 0.000000e+00 : f32
    %7 = vector.broadcast %cst_5 : f32 to vector<8x100xf32>
    %8 = arith.maximumf %6, %7 : vector<8x100xf32>
    %c0_6 = arith.constant 0 : index
    %c0_7 = arith.constant 0 : index
    %9 = vector.load %arg2[%c0_6, %c0_7] : memref<8x300xbf16, #tpu.memory_space<vmem>>, vector<8x300xbf16>
    %cst_8 = arith.constant dense<0.000000e+00> : vector<8x100xf32>
    %10 = tpu.matmul %9, %1, %cst_8 {dimension_numbers = #tpu.dot_dimension_numbers<[1], [0], [0], [1], [0, 0, 1, 1], [], []>} : vector<8x300xbf16>, vector<300x100xbf16>, vector<8x100xf32> -> vector<8x100xf32>
    %11 = vector.broadcast %2 : vector<1x100xf32> to vector<8x100xf32>
    %12 = arith.addf %10, %11 : vector<8x100xf32>
    %cst_9 = arith.constant 0.000000e+00 : f32
    %13 = vector.broadcast %cst_9 : f32 to vector<8x100xf32>
    %14 = arith.maximumf %12, %13 : vector<8x100xf32>
    %15 = tpu.iota {dimensions = array<i32: 1>} : vector<8x100xi32>
    %c50_i32 = arith.constant 50 : i32
    %16 = vector.broadcast %c50_i32 : i32 to vector<8x100xi32>
    %17 = arith.cmpi slt, %15, %16 : vector<8x100xi32>
    %18 = arith.select %17, %8, %14 : vector<8x100xi1>, vector<8x100xf32>
    %c0_10 = arith.constant 0 : index
    %c0_11 = arith.constant 0 : index
    %19 = vector.load %arg5[%c0_10, %c0_11] : memref<100x20xf32, #tpu.memory_space<vmem>>, vector<100x20xf32>
    %cst_12 = arith.constant dense<0.000000e+00> : vector<8x20xf32>
    %20 = tpu.matmul %18, %19, %cst_12 {dimension_numbers = #tpu.dot_dimension_numbers<[1], [0], [0], [1], [0, 0, 1, 1], [], []>} : vector<8x100xf32>, vector<100x20xf32>, vector<8x20xf32> -> vector<8x20xf32>
    %c0_13 = arith.constant 0 : index
    %c0_14 = arith.constant 0 : index
    %21 = vector.load %arg6[%c0_13, %c0_14] : memref<1x20xf32, #tpu.memory_space<vmem>>, vector<1x20xf32>
    %22 = vector.broadcast %21 : vector<1x20xf32> to vector<8x20xf32>
    %23 = arith.addf %20, %22 : vector<8x20xf32>
    %24 = vector.extract_strided_slice %23 {offsets = [0, 0], sizes = [8, 10], strides = [1, 1]} : vector<8x20xf32> to vector<8x10xf32>
    %cst_15 = arith.constant dense<0xFF800000> : vector<8xf32>
    %25 = vector.multi_reduction <maximumf>, %24, %cst_15 [1] : vector<8x10xf32> to vector<8xf32>
    %26 = vector.shape_cast %25 : vector<8xf32> to vector<8x1xf32>
    %27 = vector.broadcast %26 : vector<8x1xf32> to vector<8x10xf32>
    %28 = arith.subf %24, %27 : vector<8x10xf32>
    %29 = math.exp %28 : vector<8x10xf32>
    %cst_16 = arith.constant dense<0.000000e+00> : vector<8xf32>
    %30 = vector.multi_reduction <add>, %29, %cst_16 [1] : vector<8x10xf32> to vector<8xf32>
    %31 = vector.shape_cast %30 : vector<8xf32> to vector<8x1xf32>
    %32 = math.log %31 : vector<8x1xf32>
    %33 = vector.broadcast %32 : vector<8x1xf32> to vector<8x10xf32>
    %34 = arith.subf %28, %33 : vector<8x10xf32>
    %c0_17 = arith.constant 0 : index
    %c0_18 = arith.constant 0 : index
    %c0_19 = arith.constant 0 : index
    %35 = vector.load %arg7[%c0_17, %c0_18, %c0_19] : memref<2x8x10xf32, #tpu.memory_space<vmem>>, vector<1x8x10xf32>
    %36 = vector.shape_cast %35 : vector<1x8x10xf32> to vector<8x10xf32>
    %37 = vector.shape_cast %34 : vector<8x10xf32> to vector<1x8x10xf32>
    tpu.vector_store %arg7[%c0_17, %c0_18, %c0_19], %37 {strides = array<i32>} : memref<2x8x10xf32, #tpu.memory_space<vmem>>, vector<1x8x10xf32>,
    %38 = vector.extract_strided_slice %23 {offsets = [0, 10], sizes = [8, 10], strides = [1, 1]} : vector<8x20xf32> to vector<8x10xf32>
    %cst_20 = arith.constant dense<0xFF800000> : vector<8xf32>
    %39 = vector.multi_reduction <maximumf>, %38, %cst_20 [1] : vector<8x10xf32> to vector<8xf32>
    %40 = vector.shape_cast %39 : vector<8xf32> to vector<8x1xf32>
    %41 = vector.broadcast %40 : vector<8x1xf32> to vector<8x10xf32>
    %42 = arith.subf %38, %41 : vector<8x10xf32>
    %43 = math.exp %42 : vector<8x10xf32>
    %cst_21 = arith.constant dense<0.000000e+00> : vector<8xf32>
    %44 = vector.multi_reduction <add>, %43, %cst_21 [1] : vector<8x10xf32> to vector<8xf32>
    %45 = vector.shape_cast %44 : vector<8xf32> to vector<8x1xf32>
    %46 = math.log %45 : vector<8x1xf32>
    %47 = vector.broadcast %46 : vector<8x1xf32> to vector<8x10xf32>
    %48 = arith.subf %42, %47 : vector<8x10xf32>
    %c1 = arith.constant 1 : index
    %c0_22 = arith.constant 0 : index
    %c0_23 = arith.constant 0 : index
    %49 = vector.load %arg7[%c1, %c0_22, %c0_23] : memref<2x8x10xf32, #tpu.memory_space<vmem>>, vector<1x8x10xf32>
    %50 = vector.shape_cast %49 : vector<1x8x10xf32> to vector<8x10xf32>
    %51 = vector.shape_cast %48 : vector<8x10xf32> to vector<1x8x10xf32>
    tpu.vector_store %arg7[%c1, %c0_22, %c0_23], %51 {strides = array<i32>} : memref<2x8x10xf32, #tpu.memory_space<vmem>>, vector<1x8x10xf32>,
    return
  }
  func.func @transform_0(%arg0: i32) -> (i32, i32) {
    %c0_i32 = arith.constant 0 : i32
    %c0_i32_0 = arith.constant 0 : i32
    return %arg0, %c0_i32 : i32, i32
  }
  func.func @transform_1(%arg0: i32) -> (i32, i32) {
    %c0_i32 = arith.constant 0 : i32
    %c0_i32_0 = arith.constant 0 : i32
    return %arg0, %c0_i32 : i32, i32
  }
  func.func @transform_2(%arg0: i32) -> (i32, i32) {
    %c0_i32 = arith.constant 0 : i32
    %c0_i32_0 = arith.constant 0 : i32
    %c0_i32_1 = arith.constant 0 : i32
    return %c0_i32, %c0_i32_0 : i32, i32
  }
  func.func @transform_3(%arg0: i32) -> (i32, i32) {
    %c0_i32 = arith.constant 0 : i32
    %c0_i32_0 = arith.constant 0 : i32
    %c0_i32_1 = arith.constant 0 : i32
    return %c0_i32, %c0_i32_0 : i32, i32
  }
  func.func @transform_4(%arg0: i32) -> (i32, i32) {
    %c0_i32 = arith.constant 0 : i32
    %c0_i32_0 = arith.constant 0 : i32
    %c0_i32_1 = arith.constant 0 : i32
    return %c0_i32, %c0_i32_0 : i32, i32
  }
  func.func @transform_5(%arg0: i32) -> (i32, i32) {
    %c0_i32 = arith.constant 0 : i32
    %c0_i32_0 = arith.constant 0 : i32
    %c0_i32_1 = arith.constant 0 : i32
    return %c0_i32, %c0_i32_0 : i32, i32
  }
  func.func @transform_6(%arg0: i32) -> (i32, i32, i32) {
    %c0_i32 = arith.constant 0 : i32
    %c0_i32_0 = arith.constant 0 : i32
    %c0_i32_1 = arith.constant 0 : i32
    return %c0_i32, %arg0, %c0_i32_0 : i32, i32, i32
  }
}

</mosaic_0001>

<bundles_post_ra>
// kernel: tpu_custom_call.1
= control target key start
LH: loop header
LB: loop body
LE: loop exit
PB: predicated region body
PF: predicated region fallthrough
CT: control target
= control target key end

     0   :  { %11 = vsyncpa [#allocation3], 0  ;;  %s833_s0 = inlined_call_operand.vmem [shape: bf16[8,300], index: 0, kind: input, shape index: {}]   ;;  %s834_s1 = inlined_call_operand.vmem [shape: bf16[8,300], index: 1, kind: input, shape index: {}]   ;;  %s835_s2 = inlined_call_operand.hbm [shape: f32[300,100], index: 2, kind: input, shape index: {}]   ;;  %s836_s3 = inlined_call_operand.vmem [shape: f32[1,100], index: 3, kind: input, shape index: {}]   ;;  %s837_s4 = inlined_call_operand.vmem [shape: f32[100,20], index: 4, kind: input, shape index: {}]   ;;  %s838_s5 = inlined_call_operand.vmem [shape: f32[1,20], index: 5, kind: input, shape index: {}]   ;;  %s839_s6 = inlined_call_operand.hbm [shape: f32[2,8,10], index: 6, kind: output, shape index: {}]  }
   0x1   :  { %12 = vsyncpa [#allocation4], 0  ;;  %s671_s21 = smov [#allocation2]   ;;  %s623_s25 = scalar_lea.hbm %s835_s2, 4864 }
   0x2   :  { %s22_s22 = sshll.u32 %s671_s21, 4  ;;  %p624_p0 = scmp.ne.s32.totalorder %s835_s2, %s623_s25  ;;  %s23_s22 = int_to_ptr.vmem [resolvable:$true] %s22_s22 }
   0x3   :  { %p627_p1 = scmp.lt.u32.totalorder %s623_s25, %s835_s2 }
   0x5   :  { %p629_p2 = pnand %p627_p1, %p624_p0 }
   0x7   :  { %632 = shalt.err (!%p629_p2)
}
   0x8   :  { %s633_s30 = scalar_lea.vmem %s23_s22, 4864  ;;  %p638_p4 = scmp.lt.s32.totalorder %s23_s22, %s23_s22 }
   0x9   :  { %p634_p3 = scmp.ne.s32.totalorder %s23_s22, %s633_s30  ;;  %p639_p5 = scmp.lt.s32.totalorder %s633_s30, %s633_s30 }
   0xb   :  { %p640_p6 = por %p639_p5, %p638_p4 }
   0xd   :  { %p641_p7 = pnand %p640_p6, %p634_p3 }
   0xf   :  { %644 = shalt.err (!%p641_p7)
}
  0x10   :  { %s672_s7 = smov 128   ;;  %s673_s8 = smov 8  }
  0x11   :  { %28 = dma.hbm_to_vmem [thread:$0]  %s835_s2, 4864, %s23_s22, [#allocation3], %s672_s7, %s672_s7, %s673_s8  }
  0x12   :  { %667 = dma.done.wait [#allocation3], 4864  }
  0x13   :  { %668 = vsyncadd [#allocation3], 4294962432  ;;  %v674_v0 = vmov 0.0   ;;  %vm675_vm0 = vmmov 0   ;;  %v55_v1 = vld [vmem:[#allocation2 + $0x80] sm:$0xff]  ;;  %v56_v2 = vld [vmem:[#allocation2 + $0x88] sm:$0xff] }
  0x14   :  { %534 = vmatprep.subr.bf16.mxu1 %v674_v0  ;;  %540 = vmatprep.mubr.msk.bf16.mxu1 %vm675_vm0, %v674_v0  ;;  %v71_v3 = vld [vmem:[#allocation2 + $0x100] sm:$0xff]  ;;  %v85_v4 = vpack.c.bf16 %v56_v2, %v55_v1  ;;  %v72_v5 = vld [vmem:[#allocation2 + $0x108] sm:$0xff]  ;;  %v57_v10 = vld [vmem:[#allocation2 + $0x90] sm:$0xff]  ;;  %vm119_vm1 = vcmask 1045504   ;;  %vm115_vm2 = vcmask 359424   ;;  %vm328_vm3 = vcmask 1043456  }
  0x15   :  { %v39_v6 = vld [vmem:[#allocation2] sm:$0xff]  ;;  %v40_v7 = vld [vmem:[#allocation2 + $0x8] sm:$0xff]  ;;  %v732_v8 = vpack.c.bf16 %v72_v5, %v71_v3  ;;  %v58_v11 = vld [vmem:[#allocation2 + $0x98] sm:$0xff]  ;;  %vm324_vm5 = vcmask 818176   ;;  %vm416_vm6 = vcmask 162896   ;;  %vm402_vm7 = vcmask 80896  }
  0x16   :  { %v77_v9 = vpack.c.bf16 %v40_v7, %v39_v6  ;;  %v73_v12 = vld [vmem:[#allocation2 + $0x110] sm:$0xff]  ;;  %468 = vmatprep.subr.bf16.mxu0 %v85_v4  ;;  %v86_v13 = vpack.c.bf16 %v58_v11, %v57_v10  ;;  %v74_v14 = vld [vmem:[#allocation2 + $0x118] sm:$0xff]  ;;  %v59_v19 = vld [vmem:[#allocation2 + $0xa0] sm:$0xff]  ;;  %v676_v7 = vmov 0.0|0.0   ;;  %s677_s20 = smov 118  }
  0x17   :  { %v41_v15 = vld [vmem:[#allocation2 + $0x10] sm:$0xff]  ;;  %v42_v16 = vld [vmem:[#allocation2 + $0x18] sm:$0xff]  ;;  %535 = vmatpush3.bf16.msra.mxu1 %v732_v8  ;;  %v735_v17 = vpack.c.bf16 %v74_v14, %v73_v12  ;;  %v60_v20 = vld [vmem:[#allocation2 + $0xa8] sm:$0xff] }
  0x18   :  { %469 = vmatpush3.bf16.msra.mxu0 %v77_v9  ;;  %v78_v18 = vpack.c.bf16 %v42_v16, %v41_v15  ;;  %v75_v21 = vld [vmem:[#allocation2 + $0x120] sm:$0xff]  ;;  %536 = vmatprep.subr.bf16.mxu1 %v674_v0  ;;  %v87_v22 = vpack.c.bf16 %v60_v20, %v59_v19  ;;  %v76_v23 = vld [vmem:[#allocation2 + $0x128] sm:$0xf]  ;;  %v61_v27 = vld [vmem:[#allocation2 + $0xb0] sm:$0xff] }
  0x19   :  { %470 = vmatprep.subr.bf16.mxu0 %v86_v13  ;;  %v43_v24 = vld [vmem:[#allocation2 + $0x20] sm:$0xff]  ;;  %v44_v25 = vld [vmem:[#allocation2 + $0x28] sm:$0xff]  ;;  %v95_v26 = vpack.c.bf16 %v76_v23, %v75_v21  ;;  %v62_v28 = vld [vmem:[#allocation2 + $0xb8] sm:$0xff] }
  0x1a   :  { %v79_v29 = vpack.c.bf16 %v44_v25, %v43_v24  ;;  %v88_v31 = vpack.c.bf16 %v62_v28, %v61_v27  ;;  %v45_v32 = vld [vmem:[#allocation2 + $0x30] sm:$0xff]  ;;  %v46_v33 = vld [vmem:[#allocation2 + $0x38] sm:$0xff]  ;;  %v63_v34 = vld [vmem:[#allocation2 + $0xc0] sm:$0xff] }
  0x1b   :  { %537 = vmatpush3.bf16.msra.mxu1 %v735_v17  ;;  %v740_v30 = vsel %vm119_vm1, %v95_v26, 0  ;;  %v64_v35 = vld [vmem:[#allocation2 + $0xc8] sm:$0xff]  ;;  %v80_v37 = vpack.c.bf16 %v46_v33, %v45_v32  ;;  %v47_v38 = vld [vmem:[#allocation2 + $0x40] sm:$0xff]  ;;  %v65_v43 = vld [vmem:[#allocation2 + $0xd0] sm:$0xff] }
  0x1c   :  { %471 = vmatpush3.bf16.msra.mxu0 %v78_v18  ;;  %538 = vmatprep.subr.bf16.mxu1 %v674_v0  ;;  %v609_v36 = vld [vmem:[%s833_s0 + $0x8] ss:$0 sps:$4 sm:$0xff]   ;;  %v89_v39 = vpack.c.bf16 %v64_v35, %v63_v34  ;;  %v97_v41 = vld [vmem:[%s833_s0] sm:$0xff]  ;;  %v66_v44 = vld [vmem:[#allocation2 + $0xd8] sm:$0xff] }
  0x1d   :  { %472 = vmatprep.subr.bf16.mxu0 %v87_v22  ;;  %v48_v40 = vld [vmem:[#allocation2 + $0x48] sm:$0xff]  ;;  %v204_v42 = vld [vmem:[%s834_s1] sm:$0xff]  ;;  %v458_v45 = vcombine.high %v97_v41, %v97_v41  ;;  %v90_v48 = vpack.c.bf16 %v66_v44, %v65_v43  ;;  %v49_v49 = vld [vmem:[#allocation2 + $0x50] sm:$0xff]  ;;  %v457_v1 = vcombine.low %v97_v41, %v97_v41 }
  0x1e   :  { %v462_v46 = vcombine.high %v204_v42, %v204_v42  ;;  %v81_v47 = vpack.c.bf16 %v48_v40, %v47_v38  ;;  %v50_v50 = vld [vmem:[#allocation2 + $0x58] sm:$0xff]  ;;  %v67_v51 = vld [vmem:[#allocation2 + $0xe0] sm:$0xff]  ;;  %v68_v52 = vld [vmem:[#allocation2 + $0xe8] sm:$0xff]  ;;  %v461_v2 = vcombine.low %v204_v42, %v204_v42  ;;  %v300_v40 = vlaneseq }
  0x1f   :  { %539 = vmatpush3.bf16.msra.mxu1 %v740_v30  ;;  %155 = vmatprep.mubr.bf16.mxu0 %v458_v45  ;;  %v82_v53 = vpack.c.bf16 %v50_v50, %v49_v49  ;;  %v91_v54 = vpack.c.bf16 %v68_v52, %v67_v51  ;;  %v51_v55 = vld [vmem:[#allocation2 + $0x60] sm:$0xff]  ;;  %v52_v56 = vld [vmem:[#allocation2 + $0x68] sm:$0xff]  ;;  %v69_v57 = vld [vmem:[#allocation2 + $0xf0] sm:$0xff] }
  0x20   :  { %473 = vmatpush3.bf16.msra.mxu0 %v79_v29  ;;  %494 = vmatprep.subr.bf16.mxu1 %v85_v4  ;;  %v70_v58 = vld [vmem:[#allocation2 + $0xf8] sm:$0xff]  ;;  %v83_v59 = vpack.c.bf16 %v52_v56, %v51_v55  ;;  %v53_v61 = vld [vmem:[#allocation2 + $0x70] sm:$0xff]  ;;  %v614_v3 = vld [vmem:[%s834_s1 + $0x8] ss:$0 sps:$4 sm:$0xff]   ;;  %v301_v41 = vand.u32 127, %v300_v40 }
  0x21   :  { %474 = vmatprep.subr.bf16.mxu0 %v88_v31  ;;  %v92_v60 = vpack.c.bf16 %v70_v58, %v69_v57  ;;  %v54_v62 = vld [vmem:[#allocation2 + $0x78] sm:$0xff]  ;;  %v304_v4 = vld [vmem:[%s837_s4] sm:$0xff]  ;;  %v305_v5 = vld [vmem:[%s837_s4 + $0x8] sm:$0xff] }
  0x22   :  { %541 = vmatmul.mubr.msk.bf16.vlgmr.msra.gmra.mrb[0].mxu1 %vm115_vm2, %v609_v36  ;;  %v84_v63 = vpack.c.bf16 %v54_v62, %v53_v61  ;;  %v584_v6 = vpack.c.bf16 %v305_v5, %v304_v4  ;;  %v308_v11 = vld [vmem:[%s837_s4 + $0x20] sm:$0xff]  ;;  %v309_v12 = vld [vmem:[%s837_s4 + $0x28] sm:$0xff]  ;;  %v310_v14 = vld [vmem:[%s837_s4 + $0x30] sm:$0xff]  ;;  %vm302_vm4 = vcmp.lt.s32.totalorder %v301_v41, 50 }
  0x23   :  { %495 = vmatpush3.bf16.msra.mxu1 %v77_v9  ;;  %251 = vmatprep.mubr.bf16.mxu1 %v462_v46  ;;  %v307_v9 = vld [vmem:[%s837_s4 + $0x18] sm:$0xff]  ;;  %v314_v20 = vld [vmem:[%s837_s4 + $0x50] sm:$0xff]  ;;  %v316_v23 = vld [vmem:[%s837_s4 + $0x60] sm:$0xf] }
  0x24   :  { %475 = vmatpush3.bf16.msra.mxu0 %v80_v37  ;;  %496 = vmatprep.subr.bf16.mxu1 %v86_v13  ;;  %v590_v13 = vpack.c.bf16 %v309_v12, %v308_v11  ;;  %v311_v15 = vld [vmem:[%s837_s4 + $0x38] sm:$0xff]  ;;  %v465_v51 = vld [vmem:[%s838_s5] ss:$0 sm:$0xff]  ;;  %s678_s5 = smov [#allocation5]  }
  0x25   :  { %476 = vmatprep.subr.bf16.mxu0 %v89_v39  ;;  %v593_v16 = vpack.c.bf16 %v311_v15, %v310_v14  ;;  %v315_v21 = vld [vmem:[%s837_s4 + $0x58] sm:$0xff]  ;;  %s444_s21 = sshll.u32 %s678_s5, 4  ;;  %s445_s21 = int_to_ptr.vmem [resolvable:$true] %s444_s21 }
  0x26   :  { %s645_s22 = scalar_lea.vmem %s445_s21, 256  ;;  %p650_p9 = scmp.lt.s32.totalorder %s445_s21, %s445_s21 }
  0x27   :  { %497 = vmatpush3.bf16.msra.mxu1 %v78_v18  ;;  %v313_v18 = vld [vmem:[%s837_s4 + $0x48] sm:$0xff]  ;;  %p646_p8 = scmp.ne.s32.totalorder %s445_s21, %s645_s22  ;;  %p651_p10 = scmp.lt.s32.totalorder %s645_s22, %s645_s22 }
  0x28   :  { %477 = vmatpush3.bf16.msra.mxu0 %v81_v47  ;;  %498 = vmatprep.subr.bf16.mxu1 %v87_v22  ;;  %v599_v22 = vpack.c.bf16 %v315_v21, %v314_v20 }
  0x29   :  { %478 = vmatprep.subr.bf16.mxu0 %v90_v48  ;;  %p652_p11 = por %p651_p10, %p650_p9 }
  0x2b   :  { %499 = vmatpush3.bf16.msra.mxu1 %v79_v29  ;;  %v456_v29 = vld [vmem:[%s836_s3] ss:$0 sm:$0xff]  ;;  %p653_p12 = pnand %p652_p11, %p646_p8 }
  0x2c   :  { %479 = vmatpush3.bf16.msra.mxu0 %v82_v53  ;;  %500 = vmatprep.subr.bf16.mxu1 %v88_v31 }
  0x2d   :  { %480 = vmatprep.subr.bf16.mxu0 %v91_v54 }
  0x2f   :  { %501 = vmatpush3.bf16.msra.mxu1 %v80_v37 }
  0x30   :  { %481 = vmatpush3.bf16.msra.mxu0 %v83_v59  ;;  %502 = vmatprep.subr.bf16.mxu1 %v89_v39 }
  0x31   :  { %482 = vmatprep.subr.bf16.mxu0 %v92_v60 }
  0x33   :  { %503 = vmatpush3.bf16.msra.mxu1 %v81_v47 }
  0x34   :  { %483 = vmatpush3.bf16.msra.mxu0 %v84_v63  ;;  %504 = vmatprep.subr.bf16.mxu1 %v90_v48 }
  0x35   :  { %583 = vmatprep.subr.bf16.mxu0 %v676_v7 }
  0x37   :  { %156 = vmatmul.mubr.bf16.vlgmr.msra.gmra.mrb[0].mxu0 %v457_v1  ;;  %505 = vmatpush3.bf16.msra.mxu1 %v82_v53 }
  0x38   :  { %580 = vmatprep.mubr.msk.f32.mxu0 %vm675_vm0, %v674_v0  ;;  %506 = vmatprep.subr.bf16.mxu1 %v91_v54 }
  0x39   :  { %585 = vmatpush3.bf16.msra.mxu0 %v584_v6 }
  0x3a   :  { %586 = vmatprep.subr.bf16.mxu0 %v676_v7 }
  0x3b   :  { %507 = vmatpush3.bf16.msra.mxu1 %v83_v59 }
  0x3c   :  { %508 = vmatprep.subr.bf16.mxu1 %v92_v60 }
  0x3f   :  { %509 = vmatpush3.bf16.msra.mxu1 %v84_v63 }
  0x40   :  { %544 = vmatprep.subr.bf16.mxu1 %v674_v0 }
  0x42   :  { %252 = vmatmul.mubr.bf16.vlgmr.msra.gmra.mrb[4].mxu1 %v461_v2 }
  0x43   :  { %545 = vmatpush3.bf16.msra.mxu1 %v732_v8  ;;  %550 = vmatprep.mubr.msk.bf16.mxu1 %vm675_vm0, %v674_v0  ;;  %v306_v8 = vld [vmem:[%s837_s4 + $0x10] sm:$0xff] }
  0x44   :  { %546 = vmatprep.subr.bf16.mxu1 %v674_v0  ;;  %v587_v10 = vpack.c.bf16 %v307_v9, %v306_v8 }
  0x46   :  { %588 = vmatpush3.bf16.msra.mxu0 %v587_v10 }
  0x47   :  { %547 = vmatpush3.bf16.msra.mxu1 %v735_v17  ;;  %589 = vmatprep.subr.bf16.mxu0 %v676_v7  ;;  %v312_v17 = vld [vmem:[%s837_s4 + $0x40] sm:$0xff] }
  0x48   :  { %548 = vmatprep.subr.bf16.mxu1 %v674_v0  ;;  %v596_v19 = vpack.c.bf16 %v313_v18, %v312_v17 }
  0x4a   :  { %591 = vmatpush3.bf16.msra.mxu0 %v590_v13 }
  0x4b   :  { %549 = vmatpush3.bf16.msra.mxu1 %v740_v30  ;;  %592 = vmatprep.subr.bf16.mxu0 %v676_v7 }
  0x4e   :  { %551 = vmatmul.mubr.msk.bf16.vlgmr.msra.gmra.mrb[8].mxu1 %vm115_vm2, %v614_v3  ;;  %594 = vmatpush3.bf16.msra.mxu0 %v593_v16 }
  0x4f   :  { %595 = vmatprep.subr.bf16.mxu0 %v676_v7 }
  0x52   :  { %597 = vmatpush3.bf16.msra.mxu0 %v596_v19 }
  0x53   :  { %598 = vmatprep.subr.bf16.mxu0 %v676_v7 }
  0x56   :  { %600 = vmatpush3.bf16.msra.mxu0 %v599_v22 }
  0x57   :  { %578 = vmatprep.subr.mxu0 %v674_v0 }
  0x5a   :  { %579 = vmatpush3.msk.msra.mxu0 %vm328_vm3, %v316_v23 }
  0xf5   :  { %v197_v24 = vpop.f32.mrb[0].mxu1 }
  0xf6   :  { %v542_v25 = vpop.f32.mrb[1].mxu1 }
  0xf7   :  { %v200_v26 = vpop.f32.mrb[2].mxu1 }
  0xf8   :  { %v543_v27 = vpop.f32.mrb[3].mxu1 }
 0x10a   :  { %v484_v28 = vpop.f32.mrb[0].mxu0 }
 0x10b   :  { %v485_v30 = vpop.f32.mrb[1].mxu0 }
 0x10c   :  { %v486_v31 = vadd.f32 %v485_v30, %v484_v28  ;;  %v487_v32 = vpop.f32.mrb[2].mxu0 }
 0x10d   :  { %v488_v33 = vpop.f32.mrb[3].mxu0 }
 0x10e   :  { %v158_v0 = vadd.f32 %v486_v31, %v456_v29 }
 0x110   :  { %v198_v34 = vadd.f32 %v197_v24, %v158_v0 }
 0x112   :  { %v203_v47 = vmax.f32 %v198_v34, 0.0 }
 0x115   :  { %v510_v35 = vpop.f32.mrb[4].mxu1 }
 0x116   :  { %v511_v36 = vpop.f32.mrb[5].mxu1 }
 0x117   :  { %v512_v37 = vadd.f32 %v511_v36, %v510_v35  ;;  %v513_v38 = vpop.f32.mrb[6].mxu1 }
 0x118   :  { %v514_v39 = vpop.f32.mrb[7].mxu1 }
 0x119   :  { %v254_v42 = vadd.f32 %v512_v37, %v456_v29 }
 0x121   :  { %v293_v43 = vpop.f32.mrb[8].mxu1 }
 0x122   :  { %v294_v44 = vadd.f32 %v293_v43, %v254_v42  ;;  %v552_v45 = vpop.f32.mrb[9].mxu1 }
 0x123   :  { %v296_v46 = vpop.f32.mrb[10].mxu1 }
 0x124   :  { %v299_v48 = vmax.f32 %v294_v44, 0.0  ;;  %v553_v49 = vpop.f32.mrb[11].mxu1 }
 0x126   :  { %v303_v50 = vsel %vm302_vm4, %v203_v47, %v299_v48 }
 0x127   :  { %581 = vmatmul.mubr.msk.f32.vlgmr.msra.gmra.mrb[4].mxu0 %vm324_vm5, %v303_v50 }
 0x1fa   :  { %v398_v52 = vpop.f32.mrb[4].mxu0 }
 0x1fb   :  { %v399_v53 = vadd.f32 %v465_v51, %v398_v52  ;;  %v582_v54 = vpop.f32.mrb[5].mxu0 }
 0x1fd   :  { %v417_v55 = vsel %vm416_vm6, %v399_v53, -inf  ;;  %v403_v56 = vsel %vm402_vm7, %v399_v53, -inf }
 0x1fe   :  { %418 = vmax.xlane.f32.xlu0 %v417_v55  ;;  %404 = vmax.xlane.f32.xlu1 %v403_v56 }
 0x28b   :  { %v419_v57 = vpop.xlane.xlu0 %418  ;;  %v405_v61 = vpop.xlane.xlu1 %404 }
 0x28c   :  { %v420_v58 = vsub.f32 %v399_v53, %v419_v57  ;;  %v406_v62 = vsub.f32 %v399_v53, %v405_v61 }
 0x28e   :  { %v421_v59 = vmul.f32 1.442695, %v420_v58  ;;  %v407_v63 = vmul.f32 1.442695, %v406_v62 }
 0x290   :  { %615 = vpow2.f32 %v421_v59 }
 0x291   :  { %617 = vpow2.f32 %v407_v63 }
 0x29a   :  { %v616_v60 = vpop.eup %615 }
 0x29b   :  { %424 = vrot.lane.b32.xlu0 %v616_v60, %s677_s20  ;;  %v618_v3 = vpop.eup %617 }
 0x29c   :  { %v409_v4 = vsel %vm402_vm7, %v618_v3, 0.0 }
 0x30d   :  { %v425_v1 = vpop.permute.xlu0 %424 }
 0x30e   :  { %v427_v2 = vsel %vm402_vm7, %v425_v1, 0.0 }
 0x30f   :  { %428 = vadd.xlane.f32.xlu1 %v427_v2 }
 0x313   :  { %410 = vadd.xlane.f32.xlu1 %v409_v4 }
 0x39c   :  { %v429_v5 = vpop.xlane.xlu1 %428 }
 0x39d   :  { %619 = vlog2.f32 %v429_v5 }
 0x3a0   :  { %v411_v6 = vpop.xlane.xlu1 %410 }
 0x3a1   :  { %621 = vlog2.f32 %v411_v6 }
 0x3a7   :  { %v620_v7 = vpop.eup %619 }
 0x3a8   :  { %v431_v8 = vmul.f32 0.6931472, %v620_v7 }
 0x3aa   :  { %v432_v9 = vsub.f32 %v420_v58, %v431_v8 }
 0x3ab   :  { %v622_v10 = vpop.eup %621 }
 0x3ac   :  { %v413_v11 = vmul.f32 0.6931472, %v622_v10  ;;  %434 = vrot.lane.b32.xlu1 %v432_v9, %s677_s20 }
 0x3ae   :  { %v414_v12 = vsub.f32 %v406_v62, %v413_v11 }
 0x3b0   :  { %415 = vst.msk [vmem:[#allocation5] sm:$0xff] %vm402_vm7, %v414_v12 }
 0x41e   :  { %v435_v13 = vpop.permute.xlu1 %434 }
 0x41f   :  { %438 = vst.msk [vmem:[#allocation5 + $0x8] sm:$0xff] %vm402_vm7, %v435_v13 }
 0x420   :  { %656 = shalt.err (!%p653_p12)
}
 0x421   :  { %s657_s24 = scalar_lea.hbm %s839_s6, 256 }
 0x422   :  { %p658_p13 = scmp.ne.s32.totalorder %s839_s6, %s657_s24  ;;  %p661_p0 = scmp.lt.u32.totalorder %s657_s24, %s839_s6 }
 0x424   :  { %p663_p1 = pnand %p661_p0, %p658_p13 }
 0x426   :  { %666 = shalt.err (!%p663_p1)
}
 0x427   :  { %450 = dma.vmem_to_hbm [thread:$0]  %s445_s21, 256, %s839_s6, [#allocation4], %s672_s7, %s672_s7, %s673_s8  }
 0x428   :  { %669 = dma.done.wait [#allocation4], 256  }
 0x429   :  { %670 = vsyncadd [#allocation4], 4294967040 }
 0x42a   :  { %454 = vsyncpa [#allocation3], 1 }
 0x42b   :  { %455 = vsyncpa [#allocation4], 1 }

</bundles_post_ra>
